<compile_context>
chip_gen: v7x
topology: tpu7x:2x2x1
jax: 0.10.0
libtpu: 0.0.40
codegen_flags: <defaults>
</compile_context>

<pallas_src>
import jax
import jax.numpy as jnp
from jax.experimental import pallas as pl
from jax.experimental.pallas import tpu as pltpu


# -----------------------------------------------------------------------------
# One-time probe: determine pltpu.roll's rotation convention.  Runs a plain
# pallas_call on the same (default TPU) backend as the main kernel.
# -----------------------------------------------------------------------------
def _detect_roll_sign():
    """Return +1 if pltpu.roll matches jnp.roll (element i -> i+shift), else -1."""
    n = 256

    def kernel(x_ref, o_ref):
        o_ref[...] = pltpu.roll(x_ref[...], 1, 1)

    x = jnp.tile(jnp.arange(n, dtype=jnp.float32)[None, :], (8, 1))
    y = pl.pallas_call(
        kernel, out_shape=jax.ShapeDtypeStruct((8, n), jnp.float32))(x)
    return 1 if int(y[0, 0]) == n - 1 else -1


# -----------------------------------------------------------------------------
# Fused forward kernel (G images folded into the lane axis per grid step)
# -----------------------------------------------------------------------------
def _build_kernel(C, H, W, G, treedef, roll_sign):
    HW = H * W
    GHW = G * HW
    half = C // 2
    q = C // 4
    sa_ch = max(C // 8, 1)

    def kernel(*refs):
        x_ref, o_ref = refs[0], refs[-1]
        prm = jax.tree_util.tree_unflatten(treedef, list(refs[1:-1]))

        x = x_ref[...]                                       # (C, GHW) f32

        # ---- position masks: computed ONCE in the prologue (hoisted) --------
        lane = jax.lax.broadcasted_iota(jnp.int32, (1, GHW), 1)
        img = lane // HW                                     # image index 0..G-1
        pix = lane - img * HW
        h_pos = pix // W
        w_pos = pix - h_pos * W
        mask = {}
        for dy in range(-2, 3):
            for dx in range(-2, 3):
                if dy == 0 and dx == 0:
                    continue
                ok = ((h_pos + dy >= 0) & (h_pos + dy < H) &
                      (w_pos + dx >= 0) & (w_pos + dx < W))
                mask[(dy, dx)] = ok.astype(jnp.float32)      # (1, GHW)

        def tap(a, dy, dx):
            """Zero-padded shift of `a` by (dy, dx) within each image.

            pltpu.roll wraps across image boundaries, but the per-image
            "same"-padding mask is 0 exactly where that happens.
            """
            if dy == 0 and dx == 0:
                return a
            shift = (-roll_sign * (dy * W + dx)) % GHW
            return pltpu.roll(a, shift, 1) * mask[(dy, dx)]  # XLU roll + VPU mul

        def patches3(a):
            """im2col for a 3x3 "same" conv: (9*Cin, GHW)."""
            return jnp.concatenate(
                [tap(a, dy, dx) for dy in (-1, 0, 1) for dx in (-1, 0, 1)],
                axis=0)

        def dot(name, rhs, relu=False):
            w_ref, b_ref = prm[name]
            y = jnp.dot(w_ref[...], rhs,
                        preferred_element_type=jnp.float32) + b_ref[...]
            return jnp.maximum(y, 0.0) if relu else y

        def head1(name, rhs):
            """Cout=1 1x1 conv as VPU FMAs (weight stored transposed, (K, 1))."""
            w_ref, b_ref = prm[name]
            w = w_ref[...]
            acc = w[0:1, :] * rhs[0:1, :]
            for k in range(1, rhs.shape[0]):
                acc = acc + w[k:k + 1, :] * rhs[k:k + 1, :]
            return acc + b_ref[...]

        # ---- shifted copies of x: shared by the fused 5x5 conv and pooling --
        x_taps = {(dy, dx): tap(x, dy, dx)
                  for dy in range(-2, 3) for dx in range(-2, 3)}
        patch5 = jnp.concatenate(
            [x_taps[(dy, dx)] for dy in range(-2, 3) for dx in range(-2, 3)],
            axis=0)                                          # (25C, GHW)

        # ---- fused contractions on shared RHS --------------------------------
        y5 = dot("p5", patch5)    # rows: [cc1 (via local_context) | ed0a | ed1a]
        yx = dot("px", x)         # rows: [cc1 x-half | sa1 | so1 | gate]

        cc1 = jnp.maximum(y5[0:C] + yx[0:C], 0.0)            # 1x1 + BN + ReLU
        e0pre = y5[C:C + q]
        e1pre = y5[C + q:C + 2 * q]
        sa1 = yx[C:C + sa_ch]
        so1 = jnp.maximum(yx[C + sa_ch:C + sa_ch + half], 0.0)
        lmap = yx[C + sa_ch + half:C + sa_ch + half + 2]     # gate logit map

        # ---- contrast / small-object 3x3 trunks, block-diagonally fused ------
        mid1 = jnp.concatenate([cc1, so1], axis=0)           # (C + C//2, GHW)
        mid2 = dot("p31", patches3(mid1), relu=True)         # [cc2 | so2]
        mid3 = dot("p32", patches3(mid2), relu=True)         # [cc3 | so3]
        y34 = dot("p34", mid3)                               # [cc4 | so4]
        contrast_map = jax.nn.sigmoid(y34[0:1])
        so_map = jax.nn.sigmoid(y34[1:1 + C])

        # ---- edge / self-attention heads (Cout=1 -> VPU) ----------------------
        e0 = jax.nn.sigmoid(head1("ed0b", e0pre))
        e1 = jax.nn.sigmoid(head1("ed1b", e1pre))
        self_attn = jax.nn.sigmoid(head1("sa2", sa1))
        attention = (contrast_map * (1.0 + 1.5 * 0.5 * (e0 + e1))
                     * (1.0 + self_attn))
        contrast_feat = x * attention
        so_feat = x * so_map

        # ---- local variation: avg3((x - avg3(x))^2), count_include_pad=True --
        mean_x = x_taps[(0, 0)]
        for dy in (-1, 0, 1):
            for dx in (-1, 0, 1):
                if dy == 0 and dx == 0:
                    continue
                mean_x = mean_x + x_taps[(dy, dx)]
        mean_x = mean_x * (1.0 / 9.0)
        d2 = (x - mean_x) ** 2
        row = d2 + tap(d2, 0, -1) + tap(d2, 0, 1)            # separable box sum
        local_var = (row + tap(row, -1, 0) + tap(row, 1, 0)) * (1.0 / 9.0)
        var_w = jax.nn.sigmoid(head1("lv2", dot("lv1", local_var, relu=True)))

        # ---- gate: GAP -> 1x1 -> softmax over 2  (== sigmoid of per-image mean
        # of the logit difference, since GAP commutes with the 1x1 conv) -------
        dmap = lmap[0:1] - lmap[1:2]                         # (1, GHW)
        g0 = jnp.zeros((1, GHW), jnp.float32)
        for g in range(G):
            sg = (img == g).astype(jnp.float32)              # image selector
            m = jnp.sum(dmap * sg, axis=1, keepdims=True) * (1.0 / HW)
            g0 = g0 + sg * jax.nn.sigmoid(m)
        g1 = 1.0 - g0

        out = contrast_feat * g0 + so_feat * (g1 * (1.0 + var_w))

        # ---- output transform (1x1 + folded BN) + residual --------------------
        o_ref[...] = dot("ot", out) + x

    return kernel


# -----------------------------------------------------------------------------
# Wrapper
# -----------------------------------------------------------------------------
def make_forward(params, C, H, W, N, images_per_step=None):
    """Build the jitted forward.  images_per_step=N (default) folds the whole
    batch into one kernel invocation (best on single-TC v5e/v6e); on v7x set
    images_per_step=N//2 to split the grid across the two TensorCores."""
    HW = H * W
    G = N if images_per_step is None else images_per_step
    assert N % G == 0
    GHW = G * HW
    assert GHW % 128 == 0, "per-step lane dim should be 128-aligned"
    steps = N // G

    packed = _pack_params(params, C)
    leaves, treedef = jax.tree_util.tree_flatten(packed)
    roll_sign = _detect_roll_sign()
    kernel = _build_kernel(C, H, W, G, treedef, roll_sign)

    img_spec = pl.BlockSpec((C, GHW), lambda i: (0, i))
    # Weight/bias leaves: constant block index -> DMA'd once, VMEM-resident.
    w_specs = [pl.BlockSpec(l.shape, lambda i: (0, 0)) for l in leaves]

    @jax.jit
    def fwd(x_nchw):
        # NCHW -> (C, N*H*W): channels on sublanes, images folded on lanes.
        x = jnp.transpose(x_nchw.reshape(N, C, HW).astype(jnp.float32),
                          (1, 0, 2)).reshape(C, N * HW)
        y = pl.pallas_call(
            kernel,
            out_shape=jax.ShapeDtypeStruct((C, N * HW), jnp.float32),
            grid=(steps,),
            in_specs=[img_spec] + w_specs,
            out_specs=img_spec,
            compiler_params=pltpu.CompilerParams(
                dimension_semantics=("parallel",)),
        )(x, *leaves)
        return jnp.transpose(y.reshape(C, N, HW), (1, 0, 2)).reshape(N, C, H, W)

    return fwd


# -----------------------------------------------------------------------------
# Parameter init (PyTorch conv shapes -> matmul form, eval-mode BN folded)
# -----------------------------------------------------------------------------
def _init_conv_mat(key, k, cin, cout, groups=1, scale=0.1):
    """Random PyTorch-shaped conv -> (Cout, k*k*Cin) matmul weight, (Cout,1) bias.

    Grouped convs are expanded to dense block-diagonal weights.  Column order is
    (kh, kw, cin), matching the in-kernel im2col row order."""
    kw_, kb_ = jax.random.split(key)
    cin_g, cout_g = cin // groups, cout // groups
    w_pt = jax.random.normal(kw_, (cout, cin_g, k, k), jnp.float32) * scale
    b = jax.random.normal(kb_, (cout,), jnp.float32) * scale
    w_dense = jnp.zeros((k, k, cin, cout), jnp.float32)
    for g in range(groups):
        blk = jnp.transpose(w_pt[g * cout_g:(g + 1) * cout_g], (2, 3, 1, 0))
        w_dense = w_dense.at[:, :, g * cin_g:(g + 1) * cin_g,
                             g * cout_g:(g + 1) * cout_g].set(blk)
    w_mat = jnp.transpose(w_dense, (3, 0, 1, 2)).reshape(cout, k * k * cin)
    return w_mat, b.reshape(cout, 1)


def _init_bn(key, c):
    k1, k2, k3, k4 = jax.random.split(key, 4)
    gamma = 1.0 + 0.1 * jax.random.normal(k1, (c,), jnp.float32)
    beta = 0.1 * jax.random.normal(k2, (c,), jnp.float32)
    mean = 0.1 * jax.random.normal(k3, (c,), jnp.float32)
    var = 1.0 + 0.1 * jnp.abs(jax.random.normal(k4, (c,), jnp.float32))
    return gamma, beta, mean, var


def _fold_bn(wb, bn, eps=1e-5):
    """Fold eval-mode BatchNorm into the preceding conv (matmul form)."""
    w, b = wb
    gamma, beta, mean, var = bn
    scale = gamma / jnp.sqrt(var + eps)
    return w * scale[:, None], ((b[:, 0] - mean) * scale + beta).reshape(-1, 1)


def init_params(key, C):
    keys = iter(jax.random.split(key, 32))
    conv = lambda k, ci, co, g=1: _init_conv_mat(next(keys), k, ci, co, groups=g)
    bn = lambda c: _init_bn(next(keys), c)
    p = {}
    # --- TunedLocalContrastAttention ---
    p["lc"] = conv(5, C, C, C // 4)                    # grouped 5x5 local context
    p["cc1"] = _fold_bn(conv(1, 2 * C, C), bn(C))
    p["cc2"] = _fold_bn(conv(3, C, C // 2), bn(C // 2))
    p["cc3"] = _fold_bn(conv(3, C // 2, C // 2), bn(C // 2))
    p["cc4"] = conv(1, C // 2, 1)
    p["ed0a"] = conv(3, C, C // 4, C // 4)
    p["ed0b"] = conv(1, C // 4, 1)
    p["ed1a"] = conv(5, C, C // 4, C // 4)
    p["ed1b"] = conv(1, C // 4, 1)
    p["sa1"] = conv(1, C, max(C // 8, 1))
    p["sa2"] = conv(1, max(C // 8, 1), 1)
    # --- Hybrid branches ---
    p["so1"] = _fold_bn(conv(1, C, C // 2), bn(C // 2))
    p["so2"] = _fold_bn(conv(3, C // 2, C // 2), bn(C // 2))
    p["so3"] = _fold_bn(conv(3, C // 2, C // 2), bn(C // 2))
    p["so4"] = conv(1, C // 2, C)
    p["lv1"] = conv(1, C, C // 4)
    p["lv2"] = conv(1, C // 4, 1)
    p["gate"] = conv(1, C, 2)                          # GAP -> 1x1 conv -> softmax
    p["ot"] = _fold_bn(conv(1, C, C), bn(C))
    return p


# -----------------------------------------------------------------------------
# Host-side weight packing: fuse shared-RHS contractions into stacked weights
# -----------------------------------------------------------------------------
def _embed_3x3_in_5x5(w3, cin):
    """(Cout, 9*cin) weight in 3x3 column layout -> (Cout, 25*cin) 5x5 layout."""
    cout = w3.shape[0]
    w5 = jnp.zeros((cout, 5, 5, cin), jnp.float32)
    w5 = w5.at[:, 1:4, 1:4, :].set(w3.reshape(cout, 3, 3, cin))
    return w5.reshape(cout, 25 * cin)


def _stack_on_concat_input(ws, cins, k):
    """Stack convs acting on disjoint channel groups of a concatenated input.

    ws[i]: (cout_i, k*k*cin_i).  Returns (sum cout_i, k*k*sum cin_i) laid out
    for the im2col of the channel-concatenated input (block-diagonal per tap)."""
    ctot = sum(cins)
    rows, off = [], 0
    for w, cin in zip(ws, cins):
        cout = w.shape[0]
        full = jnp.zeros((cout, k * k, ctot), jnp.float32)
        full = full.at[:, :, off:off + cin].set(w.reshape(cout, k * k, cin))
        rows.append(full.reshape(cout, k * k * ctot))
        off += cin
    return jnp.concatenate(rows, axis=0)


def _pack_params(p, C):
    half = C // 2

    # contrast_calc[0] (1x1 + folded BN) split into x-half / local-feat half;
    # the local_context conv is composed into the latter (both linear, exact).
    cc1_w, cc1_b = p["cc1"]
    lc_w, lc_b = p["lc"]
    cc1_wx, cc1_wlf = cc1_w[:, :C], cc1_w[:, C:]
    cc1_bias = cc1_b + cc1_wlf @ lc_b

    # One dot over the shared 5x5 im2col of x.
    w5 = jnp.concatenate([cc1_wlf @ lc_w,
                          _embed_3x3_in_5x5(p["ed0a"][0], C),
                          p["ed1a"][0]], axis=0)
    b5 = jnp.concatenate([jnp.zeros((C, 1), jnp.float32),
                          p["ed0a"][1], p["ed1a"][1]], axis=0)

    # One dot over x for every 1x1 conv that reads x directly.
    wx = jnp.concatenate([cc1_wx, p["sa1"][0], p["so1"][0], p["gate"][0]], axis=0)
    bx = jnp.concatenate([cc1_bias, p["sa1"][1], p["so1"][1], p["gate"][1]], axis=0)

    # Contrast / small-object trunks fused with block-diagonal weights.
    w31 = _stack_on_concat_input([p["cc2"][0], p["so2"][0]], [C, half], 3)
    b31 = jnp.concatenate([p["cc2"][1], p["so2"][1]], axis=0)
    w32 = _stack_on_concat_input([p["cc3"][0], p["so3"][0]], [half, half], 3)
    b32 = jnp.concatenate([p["cc3"][1], p["so3"][1]], axis=0)
    w34 = _stack_on_concat_input([p["cc4"][0], p["so4"][0]], [half, half], 1)
    b34 = jnp.concatenate([p["cc4"][1], p["so4"][1]], axis=0)

    return {
        "p5": (w5, b5), "px": (wx, bx),
        "p31": (w31, b31), "p32": (w32, b32), "p34": (w34, b34),
        # Cout=1 heads stored transposed (K, 1) for VPU FMAs in the kernel.
        "ed0b": (p["ed0b"][0].T, p["ed0b"][1]),
        "ed1b": (p["ed1b"][0].T, p["ed1b"][1]),
        "sa2": (p["sa2"][0].T, p["sa2"][1]),
        "lv2": (p["lv2"][0].T, p["lv2"][1]),
        "lv1": p["lv1"],
        "ot": p["ot"],
    }


if __name__ == "__main__":
    N, C, H, W = 2, 8, 16, 16
    key = jax.random.PRNGKey(0)
    kp, kx = jax.random.split(key)
    params = init_params(kp, C)

    # PyTorch-style NCHW input; the kernel uses a (C, N*H*W) lane-dense layout.
    x_nchw = jax.random.normal(kx, (N, C, H, W), jnp.float32)

    fwd = make_forward(params, C, H, W, N)
    y = fwd(x_nchw)
    jax.block_until_ready(y)
    assert y.shape == (N, C, H, W)
    assert bool(jnp.all(jnp.isfinite(y)))
    print("KERNEL_OK")
</pallas_src>

<mosaic_0001>
module attributes {stable_mosaic.version = 11 : i64} {
  func.func @kernel(%arg0: memref<8x256xf32, #tpu.memory_space<vmem>>, %arg1: memref<8x256xf32, #tpu.memory_space<vmem>>) attributes {dimension_semantics = [], scalar_prefetch = 0 : i64, scratch_operands = 0 : i64, tpu.core_type = #tpu.core_type<tc>} {
    %c0 = arith.constant 0 : index
    %c0_0 = arith.constant 0 : index
    %0 = vector.load %arg0[%c0, %c0_0] : memref<8x256xf32, #tpu.memory_space<vmem>>, vector<8x256xf32>
    %c1_i32 = arith.constant 1 : i32
    %1 = tpu.dynamic_rotate %0 by %c1_i32 dim 1 : vector<8x256xf32>, i32 -> vector<8x256xf32>
    %c0_1 = arith.constant 0 : index
    %c0_2 = arith.constant 0 : index
    %2 = vector.load %arg1[%c0_1, %c0_2] : memref<8x256xf32, #tpu.memory_space<vmem>>, vector<8x256xf32>
    tpu.vector_store %arg1[%c0_1, %c0_2], %1 {strides = array<i32>} : memref<8x256xf32, #tpu.memory_space<vmem>>, vector<8x256xf32>,
    return
  }
}

</mosaic_0001>

<bundles_post_ra>
// kernel: tpu_custom_call.1
= control target key start
LH: loop header
LB: loop body
LE: loop exit
PB: predicated region body
PF: predicated region fallthrough
CT: control target
= control target key end

     0   :  { %6 = vsyncpa [#allocation3], 0  ;;  %s137_s0 = inlined_call_operand.hbm [shape: f32[8,256], index: 0, kind: input, shape index: {}]   ;;  %s138_s1 = inlined_call_operand.hbm [shape: f32[8,256], index: 1, kind: output, shape index: {}]  }
   0x1   :  { %7 = vsyncpa [#allocation4], 0  ;;  %s100_s6 = smov [#allocation2]   ;;  %s52_s10 = scalar_lea.hbm %s137_s0, 256 }
   0x2   :  { %s14_s7 = sshll.u32 %s100_s6, 4  ;;  %p53_p0 = scmp.ne.s32.totalorder %s137_s0, %s52_s10  ;;  %s15_s7 = int_to_ptr.vmem [resolvable:$true] %s14_s7 }
   0x3   :  { %p56_p1 = scmp.lt.u32.totalorder %s52_s10, %s137_s0 }
   0x5   :  { %p58_p2 = pnand %p56_p1, %p53_p0 }
   0x7   :  { %61 = shalt.err (!%p58_p2)
}
   0x8   :  { %s62_s15 = scalar_lea.vmem %s15_s7, 256  ;;  %p67_p4 = scmp.lt.s32.totalorder %s15_s7, %s15_s7 }
   0x9   :  { %p63_p3 = scmp.ne.s32.totalorder %s15_s7, %s62_s15  ;;  %p68_p5 = scmp.lt.s32.totalorder %s62_s15, %s62_s15 }
   0xb   :  { %p69_p6 = por %p68_p5, %p67_p4 }
   0xd   :  { %p70_p7 = pnand %p69_p6, %p63_p3 }
   0xf   :  { %73 = shalt.err (!%p70_p7)
}
  0x10   :  { %17 = dma.hbm_to_vmem [thread:$0]  %s137_s0, 256, %s15_s7, [#allocation3]  }
  0x11   :  { %96 = dma.done.wait [#allocation3], 256  }
  0x12   :  { %97 = vsyncadd [#allocation3], 4294967040  ;;  %v21_v0 = vld [vmem:[#allocation2] sm:$0xff]  ;;  %s101_s18 = smov 1   ;;  %v22_v1 = vld [vmem:[#allocation2 + $0x8] sm:$0xff]  ;;  %v27_v2 = vlaneseq  ;;  %s102_s19 = smov [#allocation5]  }
  0x13   :  { %23 = vrot.lane.b32.xlu0 %v21_v0, %s101_s18  ;;  %s40_s20 = sshll.u32 %s102_s19, 4  ;;  %s41_s20 = int_to_ptr.vmem [resolvable:$true] %s40_s20 }
  0x14   :  { %v28_v3 = vand.u32 127, %v27_v2  ;;  %s74_s0 = scalar_lea.vmem %s41_s20, 256  ;;  %p79_p9 = scmp.lt.s32.totalorder %s41_s20, %s41_s20 }
  0x15   :  { %p75_p8 = scmp.ne.s32.totalorder %s41_s20, %s74_s0  ;;  %p80_p10 = scmp.lt.s32.totalorder %s74_s0, %s74_s0 }
  0x16   :  { %vm29_vm0 = vcmp.lt.s32.totalorder %v28_v3, 1 }
  0x17   :  { %25 = vrot.lane.b32.xlu0 %v22_v1, %s101_s18  ;;  %p81_p11 = por %p80_p10, %p79_p9 }
  0x19   :  { %p82_p12 = pnand %p81_p11, %p75_p8 }
  0x85   :  { %v24_v4 = vpop.permute.xlu0 %23 }
  0x89   :  { %v26_v5 = vpop.permute.xlu0 %25 }
  0x8a   :  { %v30_v6 = vsel %vm29_vm0, %v24_v4, %v26_v5  ;;  %v31_v7 = vsel %vm29_vm0, %v26_v5, %v24_v4 }
  0x8b   :  { %32 = vst [vmem:[#allocation5] sm:$0xff] %v31_v7  ;;  %33 = vst [vmem:[#allocation5 + $0x8] sm:$0xff] %v30_v6 }
  0x8c   :  { %85 = shalt.err (!%p82_p12)
}
  0x8d   :  { %s86_s23 = scalar_lea.hbm %s138_s1, 256 }
  0x8e   :  { %p87_p13 = scmp.ne.s32.totalorder %s138_s1, %s86_s23  ;;  %p90_p0 = scmp.lt.u32.totalorder %s86_s23, %s138_s1 }
  0x90   :  { %p92_p1 = pnand %p90_p0, %p87_p13 }
  0x92   :  { %95 = shalt.err (!%p92_p1)
}
  0x93   :  { %43 = dma.vmem_to_hbm [thread:$0]  %s41_s20, 256, %s138_s1, [#allocation4]  }
  0x94   :  { %98 = dma.done.wait [#allocation4], 256  }
  0x95   :  { %99 = vsyncadd [#allocation4], 4294967040 }
  0x96   :  { %47 = vsyncpa [#allocation3], 1 }
  0x97   :  { %48 = vsyncpa [#allocation4], 1 }

</bundles_post_ra>
